<compile_context>
chip_gen: v7x
topology: tpu7x:2x2x1
jax: 0.10.0
libtpu: 0.0.40
codegen_flags: <defaults>
</compile_context>

<pallas_src>
import functools

import jax
import jax.numpy as jnp
from jax.experimental import pallas as pl
from jax.experimental.pallas import tpu as pltpu

_DEFAULT_VMEM_CAPACITY = 64 * 1024 * 1024   # conservative fallback (v7x per-TC VMEM)


@functools.lru_cache(maxsize=1)
def _vmem_budgets():
    """Generation-aware budgets: (input-stream budget, scoped vmem limit)."""
    try:
        cap = int(pltpu.get_tpu_info().vmem_capacity_bytes)
    except Exception:
        cap = _DEFAULT_VMEM_CAPACITY
    cap = max(cap, 32 * 1024 * 1024)
    vmem_limit = (cap * 3) // 4            # leave headroom for mask/output/compiler scratch
    input_budget = vmem_limit // 2         # both double-buffered input streams
    return input_budget, vmem_limit


def _loss_kernel(pred_ref, gt_ref, mask_ref, out_ref, *, rows, tile_rows):
    """Accumulate face/mouth squared-error sums over one (tile_rows, V) block."""
    k = pl.program_id(0)

    @pl.when(k == 0)
    def _init():
        out_ref[...] = jnp.zeros_like(out_ref)

    diff = pred_ref[...].astype(jnp.float32) - gt_ref[...].astype(jnp.float32)
    sq = diff * diff                                        # (tile_rows, V) f32

    def _accumulate(sq_val):
        # Reduce the row (sublane) axis first; the mask multiply then only
        # touches a (1, V) vector instead of the full tile.
        colsum = jnp.sum(sq_val, axis=0, keepdims=True)     # (1, V)
        face = jnp.sum(colsum, axis=1, keepdims=True)                    # (1, 1)
        mouth = jnp.sum(colsum * mask_ref[...], axis=1, keepdims=True)   # (1, 1)
        out_ref[:, 0:1] += face
        out_ref[:, 1:2] += mouth

    if rows % tile_rows == 0:
        _accumulate(sq)
    else:
        # The last row tile extends past the true row count; those sublanes
        # hold unspecified data (inputs are never padded on the host), so
        # zero them out -- but only on the last grid step.
        is_last = k == pl.num_programs(0) - 1

        @pl.when(jnp.logical_not(is_last))
        def _full_tile():
            _accumulate(sq)

        @pl.when(is_last)
        def _ragged_tile():
            row = jax.lax.broadcasted_iota(jnp.int32, sq.shape, 0)
            _accumulate(jnp.where(k * tile_rows + row < rows, sq, 0.0))


def _choose_row_tile(rows, v, in_bytes_per_elem, input_budget, row_tile):
    """Pick the row-axis tile: whole slab if it fits, else a multiple of 8."""
    if row_tile is not None:
        tile_rows = int(row_tile)
        if tile_rows >= rows:
            return rows, 1
        if tile_rows % 8 != 0:
            raise ValueError("row_tile must be a multiple of 8")
        return tile_rows, pl.cdiv(rows, tile_rows)
    # Both input streams, double-buffered by the pipeline.
    bytes_per_row = v * in_bytes_per_elem * 2
    max_rows = input_budget // max(bytes_per_row, 1)
    if rows <= max_rows:
        return rows, 1                       # single full-extent block
    tile_rows = max(8, (max_rows // 8) * 8)
    return tile_rows, pl.cdiv(rows, tile_rows)


@functools.partial(jax.jit, static_argnames=("mouth_vert_weight", "row_tile"))
def overall_loss(pred_vert_offset, gt_vert_offset, mouth_mask,
                 mouth_vert_weight=1.0, row_tile=None):
    """
    Args:
        pred_vert_offset: [B, 3, V] float (f32/bf16/f16) predicted vertex offsets
        gt_vert_offset:   [B, 3, V] float ground-truth vertex offsets
        mouth_mask:       [V] 1.0 at mouth vertex indices else 0.0
        mouth_vert_weight: python float, weight for the mouth term
        row_tile: optional override of the row-axis tile (testing/tuning)
    Returns:
        dict with 'loss', 'pos_loss', 'face_pos_loss', 'mouth_pos_loss'
    """
    if pred_vert_offset.ndim != 3 or gt_vert_offset.ndim != 3:
        raise ValueError("Input data dimensions are not as expected.")

    b, c, v = pred_vert_offset.shape
    rows = b * c

    # bf16/f16 are read directly (half HBM traffic) and upcast in-kernel;
    # anything else goes through f32 once.
    def _as_kernel_dtype(x):
        if jnp.issubdtype(x.dtype, jnp.floating) and x.dtype.itemsize <= 4:
            return x
        return x.astype(jnp.float32)

    pred2d = _as_kernel_dtype(pred_vert_offset).reshape(rows, v)   # free row-major merge
    gt2d = _as_kernel_dtype(gt_vert_offset).reshape(rows, v)
    mask2d = mouth_mask.astype(jnp.float32).reshape(1, v)

    input_budget, vmem_limit = _vmem_budgets()
    in_bytes = pred2d.dtype.itemsize + gt2d.dtype.itemsize
    tile_rows, n_tiles = _choose_row_tile(rows, v, in_bytes, input_budget, row_tile)

    kernel = functools.partial(_loss_kernel, rows=rows, tile_rows=tile_rows)

    sums = pl.pallas_call(
        kernel,
        out_shape=jax.ShapeDtypeStruct((1, 2), jnp.float32),
        grid_spec=pltpu.PrefetchScalarGridSpec(
            num_scalar_prefetch=0,
            grid=(n_tiles,),
            in_specs=[
                pl.BlockSpec((tile_rows, v), lambda k: (k, 0)),   # contiguous row tile
                pl.BlockSpec((tile_rows, v), lambda k: (k, 0)),
                pl.BlockSpec((1, v), lambda k: (0, 0)),           # mask stays VMEM-resident
            ],
            out_specs=pl.BlockSpec((1, 2), lambda k: (0, 0)),     # resident accumulator
        ),
        compiler_params=pltpu.CompilerParams(
            dimension_semantics=("arbitrary",),    # accumulator carried across the grid
            vmem_limit_bytes=vmem_limit,
        ),
    )(pred2d, gt2d, mask2d)

    face_pos_loss = sums[0, 0]
    mouth_pos_loss = jnp.float32(mouth_vert_weight) * sums[0, 1]
    pos_loss = face_pos_loss + mouth_pos_loss
    loss = pos_loss
    return {
        "loss": loss,
        "pos_loss": pos_loss,
        "face_pos_loss": face_pos_loss,
        "mouth_pos_loss": mouth_pos_loss,
    }


if __name__ == "__main__":
    key = jax.random.PRNGKey(0)
    k1, k2, k3 = jax.random.split(key, 3)

    # Small synthetic shapes consistent with the module:
    # mini_batch_size (= seq_len) = 4, 3 coordinate channels, num_vertex = 300.
    B, C, V = 4, 3, 300
    MOUTH_VERT_WEIGHT = 10.0

    pred = jax.random.normal(k1, (B, C, V), dtype=jnp.float32)
    gt = jax.random.normal(k2, (B, C, V), dtype=jnp.float32)

    # Deterministic synthetic mouth vertex indices (stand-in for the pickle file).
    n_mouth = 48
    mouth_idx = jax.random.permutation(k3, V)[:n_mouth]
    mouth_mask = jnp.zeros((V,), jnp.float32).at[mouth_idx].set(1.0)

    # Pure-JAX reference (same math as the PyTorch forward).
    diff = pred - gt
    face_ref = jnp.sum(diff * diff)
    mouth_ref = MOUTH_VERT_WEIGHT * jnp.sum(diff[:, :, mouth_idx] ** 2)
    ref = {
        "face_pos_loss": face_ref,
        "mouth_pos_loss": mouth_ref,
        "pos_loss": face_ref + mouth_ref,
        "loss": face_ref + mouth_ref,
    }

    # 1) Default path: whole (rows, V) slab in a single full-extent block.
    out = overall_loss(pred, gt, mouth_mask, mouth_vert_weight=MOUTH_VERT_WEIGHT)
    out = jax.tree_util.tree_map(jax.block_until_ready, out)
    for name, val in ref.items():
        assert jnp.allclose(out[name], val, rtol=1e-5, atol=1e-4), (name, out[name], val)

    # 2) Forced row tiling: rows = 12, tile = 8 -> 2 tiles, ragged last tile
    #    (exercises the accumulator grid and the pl.when-guarded sublane mask).
    out_t = overall_loss(pred, gt, mouth_mask,
                         mouth_vert_weight=MOUTH_VERT_WEIGHT, row_tile=8)
    out_t = jax.tree_util.tree_map(jax.block_until_ready, out_t)
    for name, val in ref.items():
        assert jnp.allclose(out_t[name], val, rtol=1e-5, atol=1e-4), (name, out_t[name], val)

    # 3) bf16 pass-through: inputs are not cast in the wrapper, upcast happens
    #    inside the kernel; reference reproduces the same f32 math.
    pred_bf = pred.astype(jnp.bfloat16)
    gt_bf = gt.astype(jnp.bfloat16)
    diff_bf = pred_bf.astype(jnp.float32) - gt_bf.astype(jnp.float32)
    face_bf = jnp.sum(diff_bf * diff_bf)
    mouth_bf = MOUTH_VERT_WEIGHT * jnp.sum(diff_bf[:, :, mouth_idx] ** 2)
    out_bf = overall_loss(pred_bf, gt_bf, mouth_mask,
                          mouth_vert_weight=MOUTH_VERT_WEIGHT)
    out_bf = jax.tree_util.tree_map(jax.block_until_ready, out_bf)
    assert jnp.allclose(out_bf["face_pos_loss"], face_bf, rtol=1e-5, atol=1e-4)
    assert jnp.allclose(out_bf["mouth_pos_loss"], mouth_bf, rtol=1e-5, atol=1e-4)

    print("KERNEL_OK")
</pallas_src>

<mosaic_0001>
module attributes {stable_mosaic.version = 11 : i64} {
  func.func @_loss_kernel(%arg0: i32, %arg1: memref<12x300xf32, #tpu.memory_space<vmem>>, %arg2: memref<12x300xf32, #tpu.memory_space<vmem>>, %arg3: memref<1x300xf32, #tpu.memory_space<vmem>>, %arg4: memref<1x2xf32, #tpu.memory_space<vmem>>) attributes {dimension_semantics = [#tpu.dimension_semantics<arbitrary>], iteration_bounds = array<i64: 1>, scalar_prefetch = 0 : i64, scratch_operands = 0 : i64, tpu.core_type = #tpu.core_type<tc>, window_params = [{transform_indices = @transform_0, window_bounds = array<i64: 12, 300>}, {transform_indices = @transform_1, window_bounds = array<i64: 12, 300>}, {pipeline_mode = #tpu.pipeline_mode<synchronous>, transform_indices = @transform_2, window_bounds = array<i64: 1, 300>}, {pipeline_mode = #tpu.pipeline_mode<synchronous>, transform_indices = @transform_3, window_bounds = array<i64: 1, 2>}]} {
    %c0_i32 = arith.constant 0 : i32
    %0 = arith.cmpi eq, %arg0, %c0_i32 : i32
    %1 = arith.extui %0 : i1 to i32
    %c0_i32_0 = arith.constant 0 : i32
    %2 = arith.cmpi ne, %1, %c0_i32_0 : i32
    scf.if %2 {
      %cst_15 = arith.constant 0.000000e+00 : f32
      %21 = vector.broadcast %cst_15 : f32 to vector<1x2xf32>
      %c0_16 = arith.constant 0 : index
      %c0_17 = arith.constant 0 : index
      %22 = vector.load %arg4[%c0_16, %c0_17] : memref<1x2xf32, #tpu.memory_space<vmem>>, vector<1x2xf32>
      tpu.vector_store %arg4[%c0_16, %c0_17], %21 {strides = array<i32>} : memref<1x2xf32, #tpu.memory_space<vmem>>, vector<1x2xf32>,
    } else {
    }
    %c0 = arith.constant 0 : index
    %c0_1 = arith.constant 0 : index
    %3 = vector.load %arg1[%c0, %c0_1] : memref<12x300xf32, #tpu.memory_space<vmem>>, vector<12x300xf32>
    %c0_2 = arith.constant 0 : index
    %c0_3 = arith.constant 0 : index
    %4 = vector.load %arg2[%c0_2, %c0_3] : memref<12x300xf32, #tpu.memory_space<vmem>>, vector<12x300xf32>
    %5 = arith.subf %3, %4 : vector<12x300xf32>
    %6 = arith.mulf %5, %5 : vector<12x300xf32>
    %cst = arith.constant dense<0.000000e+00> : vector<300xf32>
    %7 = vector.multi_reduction <add>, %6, %cst [0] : vector<12x300xf32> to vector<300xf32>
    %8 = vector.shape_cast %7 : vector<300xf32> to vector<1x300xf32>
    %cst_4 = arith.constant dense<0.000000e+00> : vector<1xf32>
    %9 = vector.multi_reduction <add>, %8, %cst_4 [1] : vector<1x300xf32> to vector<1xf32>
    %10 = vector.shape_cast %9 : vector<1xf32> to vector<1x1xf32>
    %c0_5 = arith.constant 0 : index
    %c0_6 = arith.constant 0 : index
    %11 = vector.load %arg3[%c0_5, %c0_6] : memref<1x300xf32, #tpu.memory_space<vmem>>, vector<1x300xf32>
    %12 = arith.mulf %8, %11 : vector<1x300xf32>
    %cst_7 = arith.constant dense<0.000000e+00> : vector<1xf32>
    %13 = vector.multi_reduction <add>, %12, %cst_7 [1] : vector<1x300xf32> to vector<1xf32>
    %14 = vector.shape_cast %13 : vector<1xf32> to vector<1x1xf32>
    %c0_8 = arith.constant 0 : index
    %c0_9 = arith.constant 0 : index
    %15 = vector.load %arg4[%c0_8, %c0_9] : memref<1x2xf32, #tpu.memory_space<vmem>>, vector<1x1xf32>
    %16 = arith.addf %15, %10 : vector<1x1xf32>
    %c0_10 = arith.constant 0 : index
    %c0_11 = arith.constant 0 : index
    %17 = vector.load %arg4[%c0_10, %c0_11] : memref<1x2xf32, #tpu.memory_space<vmem>>, vector<1x1xf32>
    tpu.vector_store %arg4[%c0_10, %c0_11], %16 {strides = array<i32>} : memref<1x2xf32, #tpu.memory_space<vmem>>, vector<1x1xf32>,
    %c0_12 = arith.constant 0 : index
    %c1 = arith.constant 1 : index
    %18 = vector.load %arg4[%c0_12, %c1] : memref<1x2xf32, #tpu.memory_space<vmem>>, vector<1x1xf32>
    %19 = arith.addf %18, %14 : vector<1x1xf32>
    %c0_13 = arith.constant 0 : index
    %c1_14 = arith.constant 1 : index
    %20 = vector.load %arg4[%c0_13, %c1_14] : memref<1x2xf32, #tpu.memory_space<vmem>>, vector<1x1xf32>
    tpu.vector_store %arg4[%c0_13, %c1_14], %19 {strides = array<i32>} : memref<1x2xf32, #tpu.memory_space<vmem>>, vector<1x1xf32>,
    return
  }
  func.func @transform_0(%arg0: i32) -> (i32, i32) {
    %c0_i32 = arith.constant 0 : i32
    %c0_i32_0 = arith.constant 0 : i32
    return %arg0, %c0_i32 : i32, i32
  }
  func.func @transform_1(%arg0: i32) -> (i32, i32) {
    %c0_i32 = arith.constant 0 : i32
    %c0_i32_0 = arith.constant 0 : i32
    return %arg0, %c0_i32 : i32, i32
  }
  func.func @transform_2(%arg0: i32) -> (i32, i32) {
    %c0_i32 = arith.constant 0 : i32
    %c0_i32_0 = arith.constant 0 : i32
    %c0_i32_1 = arith.constant 0 : i32
    return %c0_i32, %c0_i32_0 : i32, i32
  }
  func.func @transform_3(%arg0: i32) -> (i32, i32) {
    %c0_i32 = arith.constant 0 : i32
    %c0_i32_0 = arith.constant 0 : i32
    %c0_i32_1 = arith.constant 0 : i32
    return %c0_i32, %c0_i32_0 : i32, i32
  }
}

</mosaic_0001>

<bundles_post_ra>
// kernel: overall_loss.1
= control target key start
LH: loop header
LB: loop body
LE: loop exit
PB: predicated region body
PF: predicated region fallthrough
CT: control target
= control target key end

     0   :  { %vm18_vm0 = vcmask 8192   ;;  %vm44_vm1 = vcmask 1043456   ;;  %v119_v15 = vmov 0.0   ;;  %vm61_vm2 = vcmask 359424   ;;  %s198_s0 = inlined_call_operand.vmem [shape: f32[12,300], index: 0, kind: input, shape index: {}]   ;;  %s199_s1 = inlined_call_operand.vmem [shape: f32[12,300], index: 1, kind: input, shape index: {}]   ;;  %s200_s3 = inlined_call_operand.vmem [shape: f32[1,2], index: 3, kind: output, shape index: {}]   ;;  %s201_s2 = inlined_call_operand.vmem [shape: f32[1,300], index: 2, kind: input, shape index: {}]  }
   0x1   :  { %v20_v0 = vld [vmem:[%s198_s0] sm:$0xff]  ;;  %v21_v1 = vld [vmem:[%s198_s0 + $0x8] sm:$0xff]  ;;  %v22_v2 = vld [vmem:[%s198_s0 + $0x10] sm:$0xff]  ;;  %19 = vst.msk [vmem:[%s200_s3] sm:$0x1] %vm18_vm0, %v119_v15  ;;  %vm63_vm3 = vcmask 355328   ;;  %v79_v25 = vlaneseq }
   0x2   :  { %v23_v3 = vld [vmem:[%s198_s0 + $0x18] sm:$0xf]  ;;  %v24_v4 = vld [vmem:[%s198_s0 + $0x20] sm:$0xf]  ;;  %v25_v5 = vld [vmem:[%s198_s0 + $0x28] sm:$0xf] }
   0x3   :  { %v26_v6 = vld [vmem:[%s199_s1] sm:$0xff]  ;;  %v27_v7 = vld [vmem:[%s199_s1 + $0x8] sm:$0xff]  ;;  %v28_v8 = vld [vmem:[%s199_s1 + $0x10] sm:$0xff]  ;;  %v80_v33 = vshrl.u32 %v79_v25, 7  ;;  %vm97_vm4 = vcmask 1040384   ;;  %vm101_vm5 = vcmask 352256  }
   0x4   :  { %v29_v9 = vld [vmem:[%s199_s1 + $0x18] sm:$0xf]  ;;  %v30_v10 = vld [vmem:[%s199_s1 + $0x20] sm:$0xf]  ;;  %v31_v11 = vld [vmem:[%s199_s1 + $0x28] sm:$0xf]  ;;  %v32_v12 = vsub.f32 %v20_v0, %v26_v6  ;;  %v33_v13 = vsub.f32 %v21_v1, %v27_v7  ;;  %v34_v14 = vsub.f32 %v22_v2, %v28_v8 }
   0x5   :  { %v35_v16 = vsub.f32 %v23_v3, %v29_v9  ;;  %v36_v17 = vsub.f32 %v24_v4, %v30_v10  ;;  %v37_v18 = vsub.f32 %v25_v5, %v31_v11  ;;  %v81_v40 = vsub.s32 0, %v80_v33  ;;  %v77_v44 = vld [vmem:[%s201_s2] sm:$0x7] }
   0x6   :  { %v38_v19 = vmul.f32 %v32_v12, %v32_v12  ;;  %v39_v20 = vmul.f32 %v33_v13, %v33_v13  ;;  %v40_v21 = vmul.f32 %v34_v14, %v34_v14  ;;  %v85_v45 = vsub.s32 1, %v80_v33 }
   0x7   :  { %v41_v22 = vmul.f32 %v35_v16, %v35_v16  ;;  %v42_v23 = vmul.f32 %v36_v17, %v36_v17  ;;  %v43_v24 = vmul.f32 %v37_v18, %v37_v18  ;;  %v89_v46 = vsub.s32 2, %v80_v33 }
   0x8   :  { %v62_v26 = vsel %vm61_vm2, %v40_v21, 0.0  ;;  %v82_v50 = vrot.slane %v77_v44, %v81_v40  ;;  %v86_v54 = vrot.slane %v77_v44, %v85_v45  ;;  %v106_v6 = vld [vmem:[%s200_s3] sm:$0x1]  ;;  %vm108_vm6 = vcmask 0  }
   0x9   :  { %v45_v27 = vsel %vm44_vm1, %v41_v22, 0.0  ;;  %v53_v28 = vsel %vm44_vm1, %v42_v23, 0.0  ;;  %v64_v29 = vsel %vm63_vm3, %v43_v24, 0.0  ;;  %v90_v55 = vrot.slane %v77_v44, %v89_v46 }
   0xa   :  { %v46_v30 = vadd.f32 %v45_v27, %v38_v19  ;;  %v54_v31 = vadd.f32 %v53_v28, %v39_v20  ;;  %v65_v32 = vadd.f32 %v64_v29, %v62_v26  ;;  %vm112_vm7 = vcmask 8200  }
   0xc   :  { %v47_v34 = vrot.slane %v46_v30, 4  ;;  %v55_v35 = vrot.slane %v54_v31, 4  ;;  %v66_v36 = vrot.slane %v65_v32, 4 }
   0xe   :  { %v48_v37 = vadd.f32 %v47_v34, %v46_v30  ;;  %v56_v38 = vadd.f32 %v55_v35, %v54_v31  ;;  %v67_v39 = vadd.f32 %v66_v36, %v65_v32 }
  0x10   :  { %v49_v41 = vrot.slane %v48_v37, 2  ;;  %v57_v42 = vrot.slane %v56_v38, 2  ;;  %v68_v43 = vrot.slane %v67_v39, 2 }
  0x12   :  { %v50_v47 = vadd.f32 %v49_v41, %v48_v37  ;;  %v58_v48 = vadd.f32 %v57_v42, %v56_v38  ;;  %v69_v49 = vadd.f32 %v68_v43, %v67_v39 }
  0x14   :  { %v51_v51 = vrot.slane %v50_v47, 1  ;;  %v59_v52 = vrot.slane %v58_v48, 1  ;;  %v70_v53 = vrot.slane %v69_v49, 1 }
  0x16   :  { %v52_v56 = vadd.f32 %v51_v51, %v50_v47  ;;  %v60_v57 = vadd.f32 %v59_v52, %v58_v48  ;;  %v71_v58 = vadd.f32 %v70_v53, %v69_v49 }
  0x18   :  { %v72_v59 = vadd.f32 %v60_v57, %v52_v56  ;;  %v73_v60 = vsel %vm61_vm2, %v71_v58, 0.0  ;;  %v94_v61 = vmul.f32 %v82_v50, %v52_v56  ;;  %v95_v62 = vmul.f32 %v86_v54, %v60_v57 }
  0x19   :  { %v96_v63 = vmul.f32 %v90_v55, %v71_v58 }
  0x1a   :  { %v74_v0 = vadd.f32 %v73_v60, %v72_v59  ;;  %v98_v1 = vsel %vm97_vm4, %v94_v61, 0.0  ;;  %v99_v2 = vsel %vm97_vm4, %v95_v62, 0.0 }
  0x1b   :  { %v100_v3 = vadd.f32 %v99_v2, %v98_v1  ;;  %v102_v4 = vsel %vm101_vm5, %v96_v63, 0.0 }
  0x1c   :  { %75 = vadd.xlane.f32.xlu0 %v74_v0 }
  0x1d   :  { %v103_v5 = vadd.f32 %v102_v4, %v100_v3 }
  0x20   :  { %104 = vadd.xlane.f32.xlu0 %v103_v5 }
  0xa9   :  { %v76_v7 = vpop.xlane.xlu0 %75 }
  0xaa   :  { %v107_v8 = vadd.f32 %v106_v6, %v76_v7 }
  0xac   :  { %109 = vst.msk [vmem:[%s200_s3] sm:$0x1] %vm108_vm6, %v107_v8 }
  0xad   :  { %v105_v9 = vpop.xlane.xlu0 %104 }
  0xb3   :  { %v110_v10 = vld [vmem:[%s200_s3] sm:$0x1] }
  0xb4   :  { %v111_v11 = vadd.f32 %v110_v10, %v105_v9 }
  0xb6   :  { %113 = vst.msk [vmem:[%s200_s3] sm:$0x1] %vm112_vm7, %v111_v11 }

</bundles_post_ra>
